<compile_context>
chip_gen: v7x
topology: tpu7x:2x2x1
jax: 0.10.0
libtpu: 0.0.40
codegen_flags: <defaults>
</compile_context>

<pallas_src>
import math

import jax
import jax.numpy as jnp
from jax.experimental import pallas as pl
from jax.experimental.pallas import tpu as pltpu


_LANE = 128
_FOOTPRINT_BUDGET = 28 * 1024 * 1024   # padded, double-buffered VMEM footprint target
_VMEM_LIMIT = 48 * 1024 * 1024          # explicit scoped-VMEM request (all generations)


def _build_pe(d_model: int, max_len: int) -> jnp.ndarray:
    """Deterministic sinusoidal positional-encoding table [max_len, d_model]."""
    position = jnp.arange(max_len, dtype=jnp.float32)[:, None]            # [L, 1]
    div_term = jnp.exp(
        jnp.arange(0, d_model, 2, dtype=jnp.float32)
        * (-math.log(10000.0) / d_model)
    )                                                                     # [D/2]
    angles = position * div_term                                          # [L, D/2]
    pe = jnp.zeros((max_len, d_model), dtype=jnp.float32)
    pe = pe.at[:, 0::2].set(jnp.sin(angles))
    pe = pe.at[:, 1::2].set(jnp.cos(angles))
    return pe


def _pe_add_kernel(x_ref, pe_ref, o_ref):
    # Layout A: x (B, tN) + pe (1, tN)   -> sublane-broadcast add
    # Layout B: x (sub, tC) + pe (sub, tC) -> same-shape add
    o_ref[...] = (x_ref[...] + pe_ref[...]).astype(o_ref.dtype)


def _sublane(itemsize: int) -> int:
    """Native sublane packing multiple: 8 (f32), 16 (bf16), 32 (int8/fp8)."""
    return max(8, 32 // itemsize)


def _round_up(v: int, m: int) -> int:
    return -(-v // m) * m


def _choose_cols(n_cols: int, bytes_per_col: int, budget_bytes: int,
                 min_steps: int = 2) -> int:
    """Largest lane-dense (multiple-of-128) column tile whose padded,
    double-buffered footprint fits `budget_bytes`.  Prefers an exact divisor
    of n_cols (no ragged last block) and, when possible, at least `min_steps`
    grid steps so v7x's two TensorCores both get work."""
    if n_cols <= _LANE:
        return n_cols                       # full extent -> always a legal block
    cap = max(_LANE, (budget_bytes // max(1, bytes_per_col)) // _LANE * _LANE)
    if n_cols >= min_steps * _LANE:
        cap = min(cap, max(_LANE, (n_cols // min_steps) // _LANE * _LANE))
    cap = min(cap, n_cols)
    cap = cap // _LANE * _LANE
    if n_cols % _LANE == 0:
        # Look for an exact 128-multiple divisor in [cap/2, cap]:
        # every store stays an unmasked full-width vst.
        t = cap
        lo = max(_LANE, cap // 2)
        while t >= lo:
            if n_cols % t == 0:
                return t
            t -= _LANE
    return cap                              # ragged final block (masked) otherwise


def positional_encoding(x: jnp.ndarray, pe_full: jnp.ndarray) -> jnp.ndarray:
    """x: [B, S, D]; pe_full: [max_len, D]. Returns x + pe[:S] (broadcast over B)."""
    B, S, D = x.shape
    N = S * D
    item = jnp.dtype(x.dtype).itemsize
    sub = _sublane(item)

    # Slice + cast pe once per call (jit the caller so this fuses/hoists).
    # Casting to x.dtype halves pe DMA bytes for bf16; slight numeric
    # difference vs torch's f32-held pe is a documented trade-off.
    pe = pe_full[:S].astype(x.dtype)

    compiler_kwargs = dict(vmem_limit_bytes=_VMEM_LIMIT)

    use_sublane_dense = (B < sub) and (N % sub == 0) and (N // sub >= _LANE)

    if not use_sublane_dense:
        # ---- Layout A: flattened (B, N) with pe (1, N) broadcast over batch.
        x2 = x.reshape(B, N)
        pe2 = pe.reshape(1, N)
        pad_b = _round_up(B, sub)
        # Padded, double-buffered footprint per column:
        #   2 * pad_b (x) + 2 * pad_b (out) + 2 * sub (pe)  rows of `item` bytes.
        bytes_per_col = item * (4 * pad_b + 2 * sub)
        tN = _choose_cols(N, bytes_per_col, _FOOTPRINT_BUDGET)
        grid = (pl.cdiv(N, tN),)

        out2 = pl.pallas_call(
            _pe_add_kernel,
            out_shape=jax.ShapeDtypeStruct((B, N), x.dtype),
            grid_spec=pltpu.PrefetchScalarGridSpec(
                num_scalar_prefetch=0,
                grid=grid,
                in_specs=[
                    pl.BlockSpec((B, tN), lambda i: (0, i)),
                    pl.BlockSpec((1, tN), lambda i: (0, i)),
                ],
                out_specs=pl.BlockSpec((B, tN), lambda i: (0, i)),
            ),
            compiler_params=pltpu.CompilerParams(
                dimension_semantics=("parallel",), **compiler_kwargs),
        )(x2, pe2)
        return out2.reshape(B, S, D)

    # ---- Layout B: small batch -> sublane-dense (sub, N/sub) slab per batch row.
    R = sub
    C = N // R
    x3 = x.reshape(B, R, C)
    pe3 = pe.reshape(R, C)
    # Footprint per column: 2*R (x) + 2*R (out) + 2*R (pe) rows of `item` bytes.
    bytes_per_col = item * 6 * R
    tC = _choose_cols(C, bytes_per_col, _FOOTPRINT_BUDGET)
    grid = (pl.cdiv(C, tC), B)   # columns outer (sharded), batch inner (pe reuse)

    out3 = pl.pallas_call(
        _pe_add_kernel,
        out_shape=jax.ShapeDtypeStruct((B, R, C), x.dtype),
        grid_spec=pltpu.PrefetchScalarGridSpec(
            num_scalar_prefetch=0,
            grid=grid,
            in_specs=[
                pl.BlockSpec((None, R, tC), lambda j, b: (b, 0, j)),
                pl.BlockSpec((R, tC), lambda j, b: (0, j)),   # pe: ignore batch axis
            ],
            out_specs=pl.BlockSpec((None, R, tC), lambda j, b: (b, 0, j)),
        ),
        compiler_params=pltpu.CompilerParams(
            dimension_semantics=("parallel", "parallel"), **compiler_kwargs),
    )(x3, pe3)
    return out3.reshape(B, S, D)


if __name__ == "__main__":
    key = jax.random.PRNGKey(0)
    k1, k2 = jax.random.split(key)
    max_len = 64  # table only needs >= S rows; construction matches module init

    pe_fn = jax.jit(positional_encoding)

    # Case 1 — shapes implied by the module (batch=2, seq=8, d_model=32):
    # exercises Layout A (flattened lane-dense view).
    B, S, D = 2, 8, 32
    x = jax.random.normal(k1, (B, S, D), dtype=jnp.float32)
    pe_full = _build_pe(D, max_len)
    out = jax.block_until_ready(pe_fn(x, pe_full))
    ref = x + pe_full[:S][None, :, :]
    assert out.shape == (B, S, D)
    assert jnp.allclose(out, ref, atol=1e-6), "layout-A mismatch vs reference"

    # Case 2 — small batch, wider model (d_model=128): exercises Layout B
    # (sublane-dense slab per batch row).
    B2, S2, D2 = 2, 8, 128
    x2 = jax.random.normal(k2, (B2, S2, D2), dtype=jnp.float32)
    pe_full2 = _build_pe(D2, max_len)
    out2 = jax.block_until_ready(pe_fn(x2, pe_full2))
    ref2 = x2 + pe_full2[:S2][None, :, :]
    assert out2.shape == (B2, S2, D2)
    assert jnp.allclose(out2, ref2, atol=1e-6), "layout-B mismatch vs reference"

    print("KERNEL_OK")
</pallas_src>

<mosaic_0001>
module attributes {stable_mosaic.version = 11 : i64} {
  func.func @_pe_add_kernel(%arg0: i32, %arg1: memref<2x128xf32, #tpu.memory_space<vmem>>, %arg2: memref<1x128xf32, #tpu.memory_space<vmem>>, %arg3: memref<2x128xf32, #tpu.memory_space<vmem>>) attributes {dimension_semantics = [#tpu.dimension_semantics<parallel>], iteration_bounds = array<i64: 2>, scalar_prefetch = 0 : i64, scratch_operands = 0 : i64, tpu.core_type = #tpu.core_type<tc>, window_params = [{transform_indices = @transform_0, window_bounds = array<i64: 2, 128>}, {transform_indices = @transform_1, window_bounds = array<i64: 1, 128>}, {transform_indices = @transform_2, window_bounds = array<i64: 2, 128>}]} {
    %c0 = arith.constant 0 : index
    %c0_0 = arith.constant 0 : index
    %0 = vector.load %arg1[%c0, %c0_0] : memref<2x128xf32, #tpu.memory_space<vmem>>, vector<2x128xf32>
    %c0_1 = arith.constant 0 : index
    %c0_2 = arith.constant 0 : index
    %1 = vector.load %arg2[%c0_1, %c0_2] : memref<1x128xf32, #tpu.memory_space<vmem>>, vector<1x128xf32>
    %2 = vector.broadcast %1 : vector<1x128xf32> to vector<2x128xf32>
    %3 = arith.addf %0, %2 : vector<2x128xf32>
    %c0_3 = arith.constant 0 : index
    %c0_4 = arith.constant 0 : index
    %4 = vector.load %arg3[%c0_3, %c0_4] : memref<2x128xf32, #tpu.memory_space<vmem>>, vector<2x128xf32>
    tpu.vector_store %arg3[%c0_3, %c0_4], %3 {strides = array<i32>} : memref<2x128xf32, #tpu.memory_space<vmem>>, vector<2x128xf32>,
    return
  }
  func.func @transform_0(%arg0: i32) -> (i32, i32) {
    %c0_i32 = arith.constant 0 : i32
    %c0_i32_0 = arith.constant 0 : i32
    return %c0_i32, %arg0 : i32, i32
  }
  func.func @transform_1(%arg0: i32) -> (i32, i32) {
    %c0_i32 = arith.constant 0 : i32
    %c0_i32_0 = arith.constant 0 : i32
    return %c0_i32, %arg0 : i32, i32
  }
  func.func @transform_2(%arg0: i32) -> (i32, i32) {
    %c0_i32 = arith.constant 0 : i32
    %c0_i32_0 = arith.constant 0 : i32
    return %c0_i32, %arg0 : i32, i32
  }
}

</mosaic_0001>

<bundles_post_ra>
// kernel: positional_encoding.1
= control target key start
LH: loop header
LB: loop body
LE: loop exit
PB: predicated region body
PF: predicated region fallthrough
CT: control target
= control target key end

     0   :  { %s247_s9 = smov 0   ;;  %s275_s0 = inlined_call_operand.vmem [shape: f32[2,256], index: 0, kind: input, shape index: {}]   ;;  %s276_s1 = inlined_call_operand.vmem [shape: f32[1,256], index: 1, kind: input, shape index: {}]   ;;  %s277_s2 = inlined_call_operand.vmem [shape: f32[2,256], index: 2, kind: output, shape index: {}]  }
   0x1 LB: > { %s225_s10 = sadd.s32 4294967295, %s249_s9   ;;  %p229_p0 = scmp.ge.s32.totalorder %s249_s9, 1  ;;  %s249_s9 = sphi %s247_s9, %s12_s9  }
   0x2   : > { %p119_p1 = scmp.lt.s32.totalorder %s249_s9, 3 }
   0x4   : > { %p120_p2 = pnand %p229_p0, %p119_p1 }
   0x5   : > { %p142_p3 = scmp.lt.s32.totalorder (!%p120_p2), %s225_s10, 1 }
   0x6   : > { %123 = sbr.rel (%p120_p2) target bundleno = 20 (0x14), region = 28 }
   0xd   : > { %s279_s10 = smov (!%p142_p3, %s225_s10), 1 }
   0xe   : > { %s230_s11 = sshll.u32 %s279_s10, 1  ;;  %s148_s14 = scalar_lea.vmem %s276_s1, %s279_s10 }
   0xf   : > { %s145_s17 = scalar_lea.vmem %s275_s0, %s230_s11  ;;  %v232_v0 = vld [vmem:[%s148_s14] ss:$0 sm:$0xff]  ;;  %s152_s20 = scalar_lea.vmem %s277_s2, %s230_s11 }
  0x10   : > { %v153_v1 = vld [vmem:[%s145_s17] sm:$0x3] }
  0x11   : > { %v161_v2 = vadd.f32 %v232_v0, %v153_v1 }
  0x13   : > { %162 = vst [vmem:[%s152_s20] sm:$0x3] %v161_v2 }
  0x14 PF: > { %s12_s9 = sadd.s32 1, %s249_s9  }
  0x15   : > { %p9_p4 = scmp.ge.s32.totalorder %s12_s9, 4  }
  0x17   :  { %11 = sbr.rel (!%p9_p4) target bundleno = 1 (0x1), region = 61 }

</bundles_post_ra>
